<compile_context>
chip_gen: v5e
topology: v5e:2x2
jax: 0.10.0
libtpu: 0.0.40
codegen_flags: <defaults>
</compile_context>

<pallas_src>
import functools

import numpy as np
import jax
import jax.numpy as jnp
from jax import lax
from jax.experimental import pallas as pl
from jax.experimental.pallas import tpu as pltpu


# --------------------------------------------------------------------------
# Fused kernel: one grid point == (batch element, scale).
# --------------------------------------------------------------------------
def _mscfm_fused_kernel(x_ref, lhs_ref, o_ref, rhs_ref, *, T, c4, H, W,
                        stride):
    # x_ref  : (1, T, c4, H*W)        this batch's channel chunk for the scale
    # lhs_ref: (1, 2*c, 9*T*c4)       fused temporal+spatial+expansion weights
    # o_ref  : (1, 1, 2*c, Ho*Wo)     2 output frames stacked on channel axis
    # rhs_ref: (9*T*c4, H*W) scratch  im2col RHS (matmul dtype, e.g. bf16)
    HW = H * W
    TC = T * c4

    # (1, T, c4, HW) -> (T*c4, HW): merging leading dims is layout-free
    # (c4 is a whole sublane tile in the test config).
    x = x_ref[0].reshape(TC, HW).astype(jnp.float32)

    # Flat zero pad of width W+1 on each side covers every 3x3 tap offset and
    # makes top/bottom (row) halo reads return zeros.  Built ONCE per grid
    # step for all T frames (previously once per frame per scale).
    zpad = jnp.zeros((TC, W + 1), jnp.float32)
    xp = jnp.concatenate([zpad, x, zpad], axis=1)            # (TC, HW+2W+2)

    # Hoisted column masks: kill taps whose true neighbour falls outside the
    # image row (the flat pad would otherwise wrap them to the adjacent row).
    col = lax.broadcasted_iota(jnp.int32, (1, HW), 1) % W
    left_ok = col >= 1
    right_ok = col <= W - 2

    # im2col RHS written straight into the VMEM scratch (no tap concat).
    # Rows ordered (tap, t_in, ci) to match the wrapper-built LHS columns.
    for di in range(3):
        for dj in range(3):
            tap = di * 3 + dj
            start = (W + 1) + (di - 1) * W + (dj - 1)
            v = xp[:, start:start + HW]
            if dj == 0:
                v = jnp.where(left_ok, v, 0.0)
            elif dj == 2:
                v = jnp.where(right_ok, v, 0.0)
            rhs_ref[tap * TC:(tap + 1) * TC, :] = v.astype(rhs_ref.dtype)

    # ONE MXU matmul per grid step (bf16 operands, f32 accumulation):
    #   (2*c, 9*T*c4) @ (9*T*c4, HW) -> (2*c, HW)
    # Row layout of the result is already (frame_offset, channel_group,
    # conv_out_channel) — i.e. torch's repeat/index/cat tail — so it stores
    # directly into the output block with no reordering.
    res = jnp.dot(lhs_ref[0], rhs_ref[...],
                  preferred_element_type=jnp.float32)

    if stride > 1:
        # TODO(synk): unexercised at stride=1 — build the strided im2col RHS
        # directly instead of full-res conv + lane-gather subsample.
        res = res.reshape(8 * c4, H, W)[:, ::stride, ::stride]
        res = res.reshape(8 * c4, -1)

    o_ref[0, 0] = res.astype(o_ref.dtype)


# --------------------------------------------------------------------------
# Wrapper-side weight folding:
#   temporal depthwise taps + 3x3 spatial weights + frame repeat/index
#   -> one (scale, 2*c, 9*T*c4) matmul LHS.
# --------------------------------------------------------------------------
def _build_fused_lhs(params, c4, T, matmul_dtype):
    # Per scale: (temporal weight name, spatial weight name, temporal pad,
    # expanded-frame -> source-frame map).  src_of replicates torch's
    # repeat(2/4) + index5/index7 + cat tail exactly.
    scale_cfg = [
        ("w11", "w21", 0, tuple(range(8))),
        ("w13", "w23", 1, tuple(range(8))),
        ("w15", "w25", 0, tuple(t // 2 for t in range(8))),
        ("w17", "w27", 0, tuple(t // 4 for t in range(8))),
    ]
    lhs = []
    for twn, swn, pad, src_of in scale_cfg:
        wt = params[twn].astype(jnp.float32)             # (c4, K)
        w2 = params[swn].astype(jnp.float32)             # (c4, c4, 3, 3)
        K = wt.shape[1]
        # S[t_exp, t_in, k] = 1 iff input frame t_in feeds tap k of the
        # temporal conv evaluated at source frame src_of[t_exp].
        S = np.zeros((8, T, K), np.float32)
        for e in range(8):
            tau = src_of[e]
            for k in range(K):
                t_in = tau + k - pad
                if 0 <= t_in < T:
                    S[e, t_in, k] = 1.0
        # M[t_exp, t_in, ci] = temporal mixing coefficient.
        M = jnp.einsum("etk,ck->etc", jnp.asarray(S), wt)        # (8, T, c4)
        w2r = w2.reshape(c4, c4, 9)                              # (co, ci, tap)
        # L[t_exp, co, tap, t_in, ci] = W2[co,ci,tap] * M[t_exp,t_in,ci]
        L = jnp.einsum("xyq,eny->exqny", w2r, M)                 # (8,c4,9,T,c4)
        lhs.append(L.reshape(8 * c4, 9 * T * c4))
    return jnp.stack(lhs, axis=0).astype(matmul_dtype)           # (4, 2c, 9Tc4)


# --------------------------------------------------------------------------
# Full MsCfm forward (single fused pallas_call)
# --------------------------------------------------------------------------
def ms_cfm_forward(x, params, n_segment=8, stride=1,
                   matmul_dtype=jnp.bfloat16):
    nt, c, h, w = x.shape
    assert n_segment == 8, "MsCfm's repeat/index tail assumes n_segment == 8"
    assert c % 4 == 0 and nt % n_segment == 0
    n = nt // n_segment
    c4 = c // 4
    T = n_segment
    HW = h * w
    ho = (h - 1) // stride + 1
    wo = (w - 1) // stride + 1

    xr = x.reshape(n, T, c, HW)                        # free view
    lhs = _build_fused_lhs(params, c4, T, matmul_dtype)

    kern = functools.partial(_mscfm_fused_kernel, T=T, c4=c4, H=h, W=w,
                             stride=stride)
    # TODO(synk): for production spatial sizes (e.g. 56x56) add an H grid axis
    # with a 1-row halo and re-budget VMEM for v7x's 64 MiB; at these shapes
    # the whole per-step working set is < 0.5 MiB.
    out = pl.pallas_call(
        kern,
        out_shape=jax.ShapeDtypeStruct((n, 4, 2 * c, ho * wo), x.dtype),
        grid=(n, 4),
        in_specs=[
            pl.BlockSpec((1, T, c4, HW), lambda b, s: (b, 0, s, 0)),
            pl.BlockSpec((1, 2 * c, 9 * T * c4), lambda b, s: (s, 0, 0)),
        ],
        out_specs=pl.BlockSpec((1, 1, 2 * c, ho * wo),
                               lambda b, s: (b, s, 0, 0)),
        scratch_shapes=[pltpu.VMEM((9 * T * c4, HW), matmul_dtype)],
        compiler_params=pltpu.CompilerParams(
            dimension_semantics=("parallel", "parallel")),
    )(xr, lhs)

    # (n, 4, 2*c, Ho*Wo) row-major == (n*8, c, Ho*Wo): frame = 2*scale + off.
    return out.reshape(nt, c, ho, wo)                  # free reshape


# --------------------------------------------------------------------------
# Pure-JAX reference (mirrors the PyTorch forward exactly) for verification
# --------------------------------------------------------------------------
def _merge_tail(x1, x3, x5, x7, nt, c, h_out, w_out):
    idx5 = jnp.array([0, 4, 1, 5, 2, 6, 3, 7])
    idx7 = jnp.array([0, 2, 4, 6, 1, 3, 5, 7])
    x5 = jnp.tile(x5, (1, 2, 1, 1, 1))[:, idx5]
    x7 = jnp.tile(x7, (1, 4, 1, 1, 1))[:, idx7]
    out = jnp.concatenate([x1, x3, x5, x7], axis=1)
    return out.reshape(nt, c, h_out, w_out)


def ref_forward(x, params, n_segment=8, stride=1):
    nt, c, h, w = x.shape
    n = nt // n_segment
    c4 = c // 4
    xv = x.reshape(n, n_segment, c, h, w).transpose(0, 2, 1, 3, 4)
    chunks = jnp.split(xv, 4, axis=1)
    tw = [params["w11"], params["w13"], params["w15"], params["w17"]]
    pads = [0, 1, 0, 0]
    sw = [params["w21"], params["w23"], params["w25"], params["w27"]]
    outs = []
    for xi, wt, pad, w2 in zip(chunks, tw, pads, sw):
        K = wt.shape[1]
        xp = jnp.pad(xi, ((0, 0), (0, 0), (pad, pad), (0, 0), (0, 0)))
        T_out = xp.shape[2] - K + 1
        acc = jnp.zeros((n, c4, T_out, h, w), jnp.float32)
        for k in range(K):
            acc = acc + wt[:, k].reshape(1, c4, 1, 1, 1) * xp[:, :, k:k + T_out]
        y2d = jnp.transpose(acc, (0, 2, 1, 3, 4)).reshape(n * T_out, c4, h, w)
        ys = lax.conv_general_dilated(
            y2d, w2, window_strides=(stride, stride), padding=((1, 1), (1, 1)),
            dimension_numbers=("NCHW", "OIHW", "NCHW"),
            precision=lax.Precision.HIGHEST)
        outs.append(ys.reshape(n, T_out, c4, h // stride, w // stride))
    x1, x3, x5, x7 = outs
    return _merge_tail(x1, x3, x5, x7, nt, c, h // stride, w // stride)


if __name__ == "__main__":
    # Small shapes consistent with the module: n_segment=8, stride=(1,1)
    n_segment, n_batch = 8, 2
    c, h, w = 32, 8, 8
    stride = 1
    nt = n_batch * n_segment
    c4 = c // 4

    key = jax.random.PRNGKey(0)
    ks = jax.random.split(key, 9)
    # Synthetic weights (shapes from MsCfm.__init__):
    #  conv1{1,3,5,7}d: depthwise Conv3d -> per-channel taps (c4, K)
    #  conv2{1,3,5,7}d: Conv2d weights (c4, c4, 3, 3)
    params = {
        "w11": 0.3 * jax.random.normal(ks[0], (c4, 1), jnp.float32),
        "w13": 0.3 * jax.random.normal(ks[1], (c4, 3), jnp.float32),
        "w15": 0.3 * jax.random.normal(ks[2], (c4, 5), jnp.float32),
        "w17": 0.3 * jax.random.normal(ks[3], (c4, 7), jnp.float32),
        "w21": 0.2 * jax.random.normal(ks[4], (c4, c4, 3, 3), jnp.float32),
        "w23": 0.2 * jax.random.normal(ks[5], (c4, c4, 3, 3), jnp.float32),
        "w25": 0.2 * jax.random.normal(ks[6], (c4, c4, 3, 3), jnp.float32),
        "w27": 0.2 * jax.random.normal(ks[7], (c4, c4, 3, 3), jnp.float32),
    }
    x = jax.random.normal(ks[8], (nt, c, h, w), jnp.float32)

    fwd = jax.jit(functools.partial(ms_cfm_forward, n_segment=n_segment,
                                    stride=stride))
    out = jax.block_until_ready(fwd(x, params))

    ref = ref_forward(x, params, n_segment=n_segment, stride=stride)
    assert out.shape == (nt, c, h // stride, w // stride), out.shape
    # bf16 MXU operands with f32 accumulation (per perf review); pass
    # matmul_dtype=jnp.float32 to ms_cfm_forward for tighter numerics.
    max_err = float(jnp.max(jnp.abs(out - ref)))
    assert jnp.allclose(out, ref, rtol=2e-2, atol=2e-2), max_err

    print("KERNEL_OK")
</pallas_src>

<mosaic_0001>
module attributes {stable_mosaic.version = 11 : i64} {
  func.func @_mscfm_fused_kernel(%arg0: i32, %arg1: i32, %arg2: memref<1x8x8x64xf32, #tpu.memory_space<vmem>>, %arg3: memref<1x64x576xbf16, #tpu.memory_space<vmem>>, %arg4: memref<1x1x64x64xf32, #tpu.memory_space<vmem>>, %arg5: memref<576x64xbf16, #tpu.memory_space<vmem>>) attributes {dimension_semantics = [#tpu.dimension_semantics<parallel>, #tpu.dimension_semantics<parallel>], iteration_bounds = array<i64: 2, 4>, scalar_prefetch = 0 : i64, scratch_operands = 1 : i64, tpu.core_type = #tpu.core_type<tc>, window_params = [{transform_indices = @transform_0, window_bounds = array<i64: 1, 8, 8, 64>}, {transform_indices = @transform_1, window_bounds = array<i64: 1, 64, 576>}, {transform_indices = @transform_2, window_bounds = array<i64: 1, 1, 64, 64>}]} {
    %c0 = arith.constant 0 : index
    %c0_0 = arith.constant 0 : index
    %c0_1 = arith.constant 0 : index
    %c0_2 = arith.constant 0 : index
    %0 = vector.load %arg2[%c0, %c0_0, %c0_1, %c0_2] : memref<1x8x8x64xf32, #tpu.memory_space<vmem>>, vector<1x8x8x64xf32>
    %1 = vector.shape_cast %0 : vector<1x8x8x64xf32> to vector<8x8x64xf32>
    %2 = vector.shape_cast %1 : vector<8x8x64xf32> to vector<64x64xf32>
    %cst = arith.constant 0.000000e+00 : f32
    %3 = vector.broadcast %cst : f32 to vector<64x9xf32>
    %4 = tpu.concatenate %3, %2, %3 in 1 : vector<64x9xf32>, vector<64x64xf32>, vector<64x9xf32> -> vector<64x82xf32>
    %5 = tpu.iota {dimensions = array<i32: 1>} : vector<1x64xi32>
    %c8_i32 = arith.constant 8 : i32
    %c0_i32 = arith.constant 0 : i32
    %6 = arith.cmpi eq, %c8_i32, %c0_i32 : i32
    %c1_i32 = arith.constant 1 : i32
    %7 = arith.select %6, %c1_i32, %c8_i32 : i32
    %8 = vector.broadcast %7 : i32 to vector<1x64xi32>
    %9 = arith.remsi %5, %8 : vector<1x64xi32>
    %c0_i32_3 = arith.constant 0 : i32
    %10 = vector.broadcast %c0_i32_3 : i32 to vector<1x64xi32>
    %11 = arith.cmpi ne, %9, %10 : vector<1x64xi32>
    %c0_i32_4 = arith.constant 0 : i32
    %12 = vector.broadcast %c0_i32_4 : i32 to vector<1x64xi32>
    %13 = arith.cmpi slt, %9, %12 : vector<1x64xi32>
    %c0_i32_5 = arith.constant 0 : i32
    %14 = arith.cmpi slt, %7, %c0_i32_5 : i32
    %15 = vector.broadcast %14 : i1 to vector<1x64xi1>
    %16 = vector.broadcast %15 : vector<1x64xi1> to vector<1x64xi1>
    %17 = arith.xori %13, %16 : vector<1x64xi1>
    %18 = arith.andi %17, %11 : vector<1x64xi1>
    %19 = vector.broadcast %7 : i32 to vector<1x64xi32>
    %20 = arith.addi %9, %19 : vector<1x64xi32>
    %21 = arith.select %18, %20, %9 : vector<1x64xi1>, vector<1x64xi32>
    %c1_i32_6 = arith.constant 1 : i32
    %22 = vector.broadcast %c1_i32_6 : i32 to vector<1x64xi32>
    %23 = arith.cmpi sge, %21, %22 : vector<1x64xi32>
    %c6_i32 = arith.constant 6 : i32
    %24 = vector.broadcast %c6_i32 : i32 to vector<1x64xi32>
    %25 = arith.cmpi sle, %21, %24 : vector<1x64xi32>
    %26 = vector.extract_strided_slice %4 {offsets = [0, 0], sizes = [64, 64], strides = [1, 1]} : vector<64x82xf32> to vector<64x64xf32>
    %cst_7 = arith.constant 0.000000e+00 : f32
    %27 = vector.shape_cast %23 : vector<1x64xi1> to vector<1x64xi1>
    %28 = vector.broadcast %27 : vector<1x64xi1> to vector<64x64xi1>
    %29 = vector.broadcast %cst_7 : f32 to vector<64x64xf32>
    %30 = arith.select %28, %26, %29 : vector<64x64xi1>, vector<64x64xf32>
    %31 = arith.truncf %30 : vector<64x64xf32> to vector<64x64xbf16>
    %c0_8 = arith.constant 0 : index
    %c0_9 = arith.constant 0 : index
    %32 = vector.load %arg5[%c0_8, %c0_9] : memref<576x64xbf16, #tpu.memory_space<vmem>>, vector<64x64xbf16>
    tpu.vector_store %arg5[%c0_8, %c0_9], %31 {strides = array<i32>} : memref<576x64xbf16, #tpu.memory_space<vmem>>, vector<64x64xbf16>,
    %33 = vector.extract_strided_slice %4 {offsets = [0, 1], sizes = [64, 64], strides = [1, 1]} : vector<64x82xf32> to vector<64x64xf32>
    %34 = arith.truncf %33 : vector<64x64xf32> to vector<64x64xbf16>
    %c64 = arith.constant 64 : index
    %c0_10 = arith.constant 0 : index
    %35 = vector.load %arg5[%c64, %c0_10] : memref<576x64xbf16, #tpu.memory_space<vmem>>, vector<64x64xbf16>
    tpu.vector_store %arg5[%c64, %c0_10], %34 {strides = array<i32>} : memref<576x64xbf16, #tpu.memory_space<vmem>>, vector<64x64xbf16>,
    %36 = vector.extract_strided_slice %4 {offsets = [0, 2], sizes = [64, 64], strides = [1, 1]} : vector<64x82xf32> to vector<64x64xf32>
    %cst_11 = arith.constant 0.000000e+00 : f32
    %37 = vector.shape_cast %25 : vector<1x64xi1> to vector<1x64xi1>
    %38 = vector.broadcast %37 : vector<1x64xi1> to vector<64x64xi1>
    %39 = vector.broadcast %cst_11 : f32 to vector<64x64xf32>
    %40 = arith.select %38, %36, %39 : vector<64x64xi1>, vector<64x64xf32>
    %41 = arith.truncf %40 : vector<64x64xf32> to vector<64x64xbf16>
    %c128 = arith.constant 128 : index
    %c0_12 = arith.constant 0 : index
    %42 = vector.load %arg5[%c128, %c0_12] : memref<576x64xbf16, #tpu.memory_space<vmem>>, vector<64x64xbf16>
    tpu.vector_store %arg5[%c128, %c0_12], %41 {strides = array<i32>} : memref<576x64xbf16, #tpu.memory_space<vmem>>, vector<64x64xbf16>,
    %43 = vector.extract_strided_slice %4 {offsets = [0, 8], sizes = [64, 64], strides = [1, 1]} : vector<64x82xf32> to vector<64x64xf32>
    %cst_13 = arith.constant 0.000000e+00 : f32
    %44 = vector.shape_cast %23 : vector<1x64xi1> to vector<1x64xi1>
    %45 = vector.broadcast %44 : vector<1x64xi1> to vector<64x64xi1>
    %46 = vector.broadcast %cst_13 : f32 to vector<64x64xf32>
    %47 = arith.select %45, %43, %46 : vector<64x64xi1>, vector<64x64xf32>
    %48 = arith.truncf %47 : vector<64x64xf32> to vector<64x64xbf16>
    %c192 = arith.constant 192 : index
    %c0_14 = arith.constant 0 : index
    %49 = vector.load %arg5[%c192, %c0_14] : memref<576x64xbf16, #tpu.memory_space<vmem>>, vector<64x64xbf16>
    tpu.vector_store %arg5[%c192, %c0_14], %48 {strides = array<i32>} : memref<576x64xbf16, #tpu.memory_space<vmem>>, vector<64x64xbf16>,
    %50 = vector.extract_strided_slice %4 {offsets = [0, 9], sizes = [64, 64], strides = [1, 1]} : vector<64x82xf32> to vector<64x64xf32>
    %51 = arith.truncf %50 : vector<64x64xf32> to vector<64x64xbf16>
    %c256 = arith.constant 256 : index
    %c0_15 = arith.constant 0 : index
    %52 = vector.load %arg5[%c256, %c0_15] : memref<576x64xbf16, #tpu.memory_space<vmem>>, vector<64x64xbf16>
    tpu.vector_store %arg5[%c256, %c0_15], %51 {strides = array<i32>} : memref<576x64xbf16, #tpu.memory_space<vmem>>, vector<64x64xbf16>,
    %53 = vector.extract_strided_slice %4 {offsets = [0, 10], sizes = [64, 64], strides = [1, 1]} : vector<64x82xf32> to vector<64x64xf32>
    %cst_16 = arith.constant 0.000000e+00 : f32
    %54 = vector.shape_cast %25 : vector<1x64xi1> to vector<1x64xi1>
    %55 = vector.broadcast %54 : vector<1x64xi1> to vector<64x64xi1>
    %56 = vector.broadcast %cst_16 : f32 to vector<64x64xf32>
    %57 = arith.select %55, %53, %56 : vector<64x64xi1>, vector<64x64xf32>
    %58 = arith.truncf %57 : vector<64x64xf32> to vector<64x64xbf16>
    %c320 = arith.constant 320 : index
    %c0_17 = arith.constant 0 : index
    %59 = vector.load %arg5[%c320, %c0_17] : memref<576x64xbf16, #tpu.memory_space<vmem>>, vector<64x64xbf16>
    tpu.vector_store %arg5[%c320, %c0_17], %58 {strides = array<i32>} : memref<576x64xbf16, #tpu.memory_space<vmem>>, vector<64x64xbf16>,
    %60 = vector.extract_strided_slice %4 {offsets = [0, 16], sizes = [64, 64], strides = [1, 1]} : vector<64x82xf32> to vector<64x64xf32>
    %cst_18 = arith.constant 0.000000e+00 : f32
    %61 = vector.shape_cast %23 : vector<1x64xi1> to vector<1x64xi1>
    %62 = vector.broadcast %61 : vector<1x64xi1> to vector<64x64xi1>
    %63 = vector.broadcast %cst_18 : f32 to vector<64x64xf32>
    %64 = arith.select %62, %60, %63 : vector<64x64xi1>, vector<64x64xf32>
    %65 = arith.truncf %64 : vector<64x64xf32> to vector<64x64xbf16>
    %c384 = arith.constant 384 : index
    %c0_19 = arith.constant 0 : index
    %66 = vector.load %arg5[%c384, %c0_19] : memref<576x64xbf16, #tpu.memory_space<vmem>>, vector<64x64xbf16>
    tpu.vector_store %arg5[%c384, %c0_19], %65 {strides = array<i32>} : memref<576x64xbf16, #tpu.memory_space<vmem>>, vector<64x64xbf16>,
    %67 = vector.extract_strided_slice %4 {offsets = [0, 17], sizes = [64, 64], strides = [1, 1]} : vector<64x82xf32> to vector<64x64xf32>
    %68 = arith.truncf %67 : vector<64x64xf32> to vector<64x64xbf16>
    %c448 = arith.constant 448 : index
    %c0_20 = arith.constant 0 : index
    %69 = vector.load %arg5[%c448, %c0_20] : memref<576x64xbf16, #tpu.memory_space<vmem>>, vector<64x64xbf16>
    tpu.vector_store %arg5[%c448, %c0_20], %68 {strides = array<i32>} : memref<576x64xbf16, #tpu.memory_space<vmem>>, vector<64x64xbf16>,
    %70 = vector.extract_strided_slice %4 {offsets = [0, 18], sizes = [64, 64], strides = [1, 1]} : vector<64x82xf32> to vector<64x64xf32>
    %cst_21 = arith.constant 0.000000e+00 : f32
    %71 = vector.shape_cast %25 : vector<1x64xi1> to vector<1x64xi1>
    %72 = vector.broadcast %71 : vector<1x64xi1> to vector<64x64xi1>
    %73 = vector.broadcast %cst_21 : f32 to vector<64x64xf32>
    %74 = arith.select %72, %70, %73 : vector<64x64xi1>, vector<64x64xf32>
    %75 = arith.truncf %74 : vector<64x64xf32> to vector<64x64xbf16>
    %c512 = arith.constant 512 : index
    %c0_22 = arith.constant 0 : index
    %76 = vector.load %arg5[%c512, %c0_22] : memref<576x64xbf16, #tpu.memory_space<vmem>>, vector<64x64xbf16>
    tpu.vector_store %arg5[%c512, %c0_22], %75 {strides = array<i32>} : memref<576x64xbf16, #tpu.memory_space<vmem>>, vector<64x64xbf16>,
    %c0_23 = arith.constant 0 : index
    %c0_24 = arith.constant 0 : index
    %c0_25 = arith.constant 0 : index
    %77 = vector.load %arg3[%c0_23, %c0_24, %c0_25] : memref<1x64x576xbf16, #tpu.memory_space<vmem>>, vector<1x64x576xbf16>
    %78 = vector.shape_cast %77 : vector<1x64x576xbf16> to vector<64x576xbf16>
    %c0_26 = arith.constant 0 : index
    %c0_27 = arith.constant 0 : index
    %79 = vector.load %arg5[%c0_26, %c0_27] : memref<576x64xbf16, #tpu.memory_space<vmem>>, vector<576x64xbf16>
    %cst_28 = arith.constant dense<0.000000e+00> : vector<64x64xf32>
    %80 = tpu.matmul %78, %79, %cst_28 {dimension_numbers = #tpu.dot_dimension_numbers<[1], [0], [0], [1], [0, 0, 1, 1], [], []>} : vector<64x576xbf16>, vector<576x64xbf16>, vector<64x64xf32> -> vector<64x64xf32>
    %c0_29 = arith.constant 0 : index
    %c0_30 = arith.constant 0 : index
    %c0_31 = arith.constant 0 : index
    %c0_32 = arith.constant 0 : index
    %81 = vector.load %arg4[%c0_29, %c0_30, %c0_31, %c0_32] : memref<1x1x64x64xf32, #tpu.memory_space<vmem>>, vector<1x1x64x64xf32>
    %82 = vector.shape_cast %81 : vector<1x1x64x64xf32> to vector<64x64xf32>
    %83 = vector.shape_cast %80 : vector<64x64xf32> to vector<1x1x64x64xf32>
    tpu.vector_store %arg4[%c0_29, %c0_30, %c0_31, %c0_32], %83 {strides = array<i32>} : memref<1x1x64x64xf32, #tpu.memory_space<vmem>>, vector<1x1x64x64xf32>,
    return
  }
  func.func @transform_0(%arg0: i32, %arg1: i32) -> (i32, i32, i32, i32) {
    %c0_i32 = arith.constant 0 : i32
    %c0_i32_0 = arith.constant 0 : i32
    %c0_i32_1 = arith.constant 0 : i32
    return %arg0, %c0_i32, %arg1, %c0_i32_0 : i32, i32, i32, i32
  }
  func.func @transform_1(%arg0: i32, %arg1: i32) -> (i32, i32, i32) {
    %c0_i32 = arith.constant 0 : i32
    %c0_i32_0 = arith.constant 0 : i32
    %c0_i32_1 = arith.constant 0 : i32
    return %arg1, %c0_i32, %c0_i32_0 : i32, i32, i32
  }
  func.func @transform_2(%arg0: i32, %arg1: i32) -> (i32, i32, i32, i32) {
    %c0_i32 = arith.constant 0 : i32
    %c0_i32_0 = arith.constant 0 : i32
    %c0_i32_1 = arith.constant 0 : i32
    return %arg0, %arg1, %c0_i32, %c0_i32_0 : i32, i32, i32, i32
  }
}

</mosaic_0001>

<bundles_post_ra>
// kernel: ms_cfm_forward.1
= control target key start
LH: loop header
LB: loop body
LE: loop exit
PB: predicated region body
PF: predicated region fallthrough
CT: control target
= control target key end

     0   :  { %s1982_s9 = smov 0   ;;  %s1984_s10 = smov 0   ;;  %s2415_s0 = inlined_call_operand.vmem [shape: f32[2,8,32,64], index: 0, kind: input, shape index: {}]   ;;  %s2416_s1 = inlined_call_operand.vmem [shape: bf16[4,64,576], index: 1, kind: input, shape index: {}]   ;;  %s2417_s2 = inlined_call_operand.vmem [shape: f32[2,4,64,64], index: 2, kind: output, shape index: {}]  }
   0x1   :  { %s1986_s11 = smov 0   ;;  %s1988_s12 = smov 0  }
   0x2   :  { %s1990_s13 = smov 0   ;;  %s1992_s14 = smov 0  }
   0x3   :  { %s1994_s15 = smov 0  }
   0x4 LB: > { %s21_s16 = sadd.s32 1, %s1948_s13  ;;  %s24_s17 = sadd.s32 1, %s1952_s14  ;;  %s1956_s15 = sphi %s1994_s15, %s12_s15   ;;  %s1952_s14 = sphi %s1992_s14, %s2427_s14   ;;  %s1948_s13 = sphi %s1990_s13, %s2426_s13   ;;  %s1944_s12 = sphi %s1988_s12, %s2425_s12   ;;  %s1940_s11 = sphi %s1986_s11, %s2424_s11   ;;  %s1936_s10 = sphi %s1984_s10, %s2423_s10   ;;  %s1932_s9 = sphi %s1982_s9, %s2422_s9  }
   0x5   : > { %p22_p0 = scmp.ge.s32.totalorder %s21_s16, 4  ;;  %p40_p1 = scmp.ne.s32.totalorder %s1936_s10, %s1932_s9 }
   0x6   : > { %p41_p2 = scmp.eq.s32.totalorder %s1956_s15, 0  ;;  %s33_s21 = sadd.s32 1, %s1936_s10 }
   0x7   : > { %s2429_s16 = smov (%p22_p0, %s21_s16), 0  ;;  %s2431_s17 = smov (!%p22_p0, %s24_s17), %s1952_s14 }
   0x8   : > { %p42_p3 = por %p41_p2, %p40_p1  ;;  %p26_p4 = scmp.ge.s32.totalorder %s2431_s17, 2 }
   0x9   : > { %s29_s18 = ssub.s32 %s1948_s13, %s2429_s16  ;;  %p1404_p6 = scmp.ge.s32.totalorder %s1956_s15, 8 }
   0xa   : > { %s2433_s17 = smov (%p26_p4, %s2431_s17), 0 }
   0xb   : > { %s28_s19 = ssub.s32 %s1952_s14, %s2433_s17  ;;  %120 = sbr.rel (%p1404_p6) target bundleno = 30 (0x1e), region = 16 }
   0xc   : > { %s30_s20 = sor.u32 %s29_s18, %s28_s19 }
   0xd   : > { %p31_p5 = scmp.eq.s32.totalorder %s30_s20, 0 }
   0xf   : > { %s2033_s22 = scalar_select %p31_p5, %s1936_s10, %s33_s21  }
  0x10   : > { %123 = sbr.rel (!%p42_p3) target bundleno = 30 (0x1e), region = 20  ;;  %s125_s23 = sand.u32 (%p42_p3), 1, %s1936_s10  }
  0x11   : > { %s1406_s24 = sshll.u32 (%p42_p3), %s1952_s14, 5  ;;  %s1405_s25 = sshll.u32 (%p42_p3), %s125_s23, 6 }
  0x12   : > { %s129_s26 = sadd.s32 (%p42_p3), %s1948_s13, %s1406_s24  ;;  %s127_s3 = scalar_lea.vmem (%p42_p3), [#allocation3], %s1405_s25 }
  0x13   : > { %s1407_s27 = sshll.u32 (%p42_p3), %s129_s26, 3 }
  0x14   : > { %s131_s30 = scalar_lea.vmem (%p42_p3), %s2415_s0, %s1407_s27 }
  0x15   : > { %v174_v0 = vld [vmem:[%s131_s30] sm:$0xff] }
  0x16   : > { %v176_v1 = vld [vmem:[%s131_s30 + $0x20] sm:$0xff]  ;;  %175 = vst [vmem:[%s127_s3] sm:$0xff] %v174_v0 }
  0x17   : > { %v178_v2 = vld [vmem:[%s131_s30 + $0x40] sm:$0xff]  ;;  %177 = vst [vmem:[%s127_s3 + $0x8] sm:$0xff] %v176_v1 }
  0x18   : > { %v180_v3 = vld [vmem:[%s131_s30 + $0x60] sm:$0xff]  ;;  %179 = vst [vmem:[%s127_s3 + $0x10] sm:$0xff] %v178_v2 }
  0x19   : > { %v182_v4 = vld [vmem:[%s131_s30 + $0x80] sm:$0xff]  ;;  %181 = vst [vmem:[%s127_s3 + $0x18] sm:$0xff] %v180_v3 }
  0x1a   : > { %v184_v5 = vld [vmem:[%s131_s30 + $0xa0] sm:$0xff]  ;;  %183 = vst [vmem:[%s127_s3 + $0x20] sm:$0xff] %v182_v4 }
  0x1b   : > { %v186_v6 = vld [vmem:[%s131_s30 + $0xc0] sm:$0xff]  ;;  %185 = vst [vmem:[%s127_s3 + $0x28] sm:$0xff] %v184_v5 }
  0x1c   : > { %v188_v7 = vld [vmem:[%s131_s30 + $0xe0] sm:$0xff]  ;;  %187 = vst [vmem:[%s127_s3 + $0x30] sm:$0xff] %v186_v6 }
  0x1d   : > { %189 = vst [vmem:[%s127_s3 + $0x38] sm:$0xff] %v188_v7 }
  0x1e PF: > { %p1408_p7 = scmp.ge.s32.totalorder %s1956_s15, 1  ;;  %p202_p8 = scmp.lt.s32.totalorder %s1956_s15, 9 }
  0x20   : > { %p203_p9 = pnand %p1408_p7, %p202_p8 }
  0x21   : > { %s209_s4 = sand.u32 (!%p203_p9), 1, %s1932_s9   ;;  %s1958_s7 = smov (!%p203_p9), 9  }
  0x22   : > { %206 = sbr.rel (%p203_p9) target bundleno = 594 (0x252), region = 62  ;;  %s1409_s5 = sshll.u32 (!%p203_p9), %s209_s4, 6 }
  0x23   : > { %s211_s6 = scalar_lea.vmem (!%p203_p9), [#allocation3], %s1409_s5  ;;  %s1959_s8 = smov (!%p203_p9), 118  }
  0x24   : > { %s1960_s9 = smov (!%p203_p9), 120   ;;  %s1961_s18 = smov (!%p203_p9), 112  }
  0x25   : > { %s1962_s19 = smov (!%p203_p9), 126   ;;  %s1963_s20 = smov (!%p203_p9), 127  }
  0x26   : > { %s1964_s21 = smov (!%p203_p9), 110   ;;  %s1965_s23 = smov (!%p203_p9), 111  }
  0x27   : > { %v260_v8 = vld [vmem:[%s211_s6 + $0x30] sm:$0xff]  ;;  %v261_v9 = vld [vmem:[%s211_s6 + $0x38] sm:$0xff]  ;;  %v258_v14 = vld [vmem:[%s211_s6 + $0x20] sm:$0xff]  ;;  %v312_v20 = vlaneseq  ;;  %vm294_vm0 = vcmask 72704   ;;  %vm303_vm1 = vcmask 596992   ;;  %vm346_vm3 = vcmask 519168  }
  0x28   : > { %v256_v10 = vld [vmem:[%s211_s6 + $0x10] sm:$0xff]  ;;  %v1782_v11 = vpack.i.bf16 %v261_v9, %v260_v8  ;;  %v257_v12 = vld [vmem:[%s211_s6 + $0x18] sm:$0xff]  ;;  %v259_v15 = vld [vmem:[%s211_s6 + $0x28] sm:$0xff]  ;;  %s1966_s24 = smov 119   ;;  %p239_p10 = scmp.lt.s32.totalorder %s1940_s11, 3  ;;  %vm1129_vm5 = vcmask 523264  }
  0x29   : > { %v1792_v13 = vpack.i.bf16 %v257_v12, %v256_v10  ;;  %v254_v16 = vld [vmem:[%s211_s6] sm:$0xff]  ;;  %v255_v17 = vld [vmem:[%s211_s6 + $0x8] sm:$0xff]  ;;  %v1787_v18 = vpack.i.bf16 %v259_v15, %v258_v14  ;;  %v2045_v21 = vand.u32 127, %v312_v20  ;;  %p244_p11 = scmp.lt.s32.totalorder %s1944_s12, 1 }
  0x2a   : > { %1783 = vrot.lane.b32.xlu0 %v1782_v11, %s1958_s7  ;;  %v1797_v19 = vpack.i.bf16 %v255_v17, %v254_v16  ;;  %s2435_s11 = smov (!%p239_p10, %s1940_s11), 3 }
  0x2b   : > { %1793 = vrot.lane.b32.xlu1 %v1792_v13, %s1958_s7  ;;  %v318_v22 = vand.u32 7, %v2045_v21  ;;  %s1716_s25 = smul.u32 160, %s2435_s11  ;;  %s2437_s12 = smov (!%p244_p11, %s1944_s12), 1 }
  0x2c   : > { %s1411_s29 = sshll.u32 %s2435_s11, 3  ;;  %s1412_s30 = sshll.u32 %s2437_s12, 5 }
  0x2d   : > { %vm2050_vm2 = vcmp.ge.s32.totalorder %v318_v22, 1  ;;  %vm2153_vm4 = vcmp.le.s32.totalorder %v318_v22, 6  ;;  %s2286_s28 = scalar_lea.vmem %s2416_s1, %s1716_s25  ;;  %s250_s3 = sadd.s32 %s1412_s30, %s1411_s29 }
  0x2e   : > { %s1413_s4 = sshll.u32 %s250_s3, 3 }
  0x32   : > { %1788 = vrot.lane.b32.xlu0 %v1787_v18, %s1958_s7 }
  0x33   : > { %1798 = vrot.lane.b32.xlu1 %v1797_v19, %s1958_s7  ;;  %s2374_s7 = scalar_lea.vmem %s2417_s2, %s1413_s4 }
  0x9c   : > { %v1784_v23 = vpop.permute.xlu0 %1783 }
  0x9d   : > { %v1786_v24 = vunpack.i.h.bf16 %v1784_v23  ;;  %v1785_v25 = vunpack.i.l.bf16 %v1784_v23  ;;  %v1794_v26 = vpop.permute.xlu1 %1793 }
  0x9e   : > { %v1796_v28 = vunpack.i.h.bf16 %v1794_v26  ;;  %v1795_v29 = vunpack.i.l.bf16 %v1794_v26 }
  0x9f   : > { %v302_v30 = vsel %vm294_vm0, 0.0, %v1786_v24  ;;  %v301_v31 = vsel %vm294_vm0, 0.0, %v1785_v25 }
  0xa0   : > { %v2057_v32 = vsel %vm303_vm1, %v302_v30, 0.0  ;;  %v2060_v33 = vsel %vm303_vm1, %v301_v31, 0.0  ;;  %v298_v34 = vsel %vm294_vm0, 0.0, %v1796_v28  ;;  %v297_v35 = vsel %vm294_vm0, 0.0, %v1795_v29 }
  0xa1   : > { %v337_v36 = vsel %vm2050_vm2, %v2057_v32, 0.0  ;;  %v336_v37 = vsel %vm2050_vm2, %v2060_v33, 0.0  ;;  %v2071_v38 = vsel %vm303_vm1, %v298_v34, 0.0  ;;  %v2074_v39 = vsel %vm303_vm1, %v297_v35, 0.0 }
  0xa2   : > { %v345_v40 = vpack.c.bf16 %v337_v36, %v337_v36  ;;  %v344_v41 = vpack.c.bf16 %v336_v37, %v336_v37  ;;  %v333_v42 = vsel %vm2050_vm2, %v2071_v38, 0.0  ;;  %v332_v43 = vsel %vm2050_vm2, %v2074_v39, 0.0 }
  0xa3   : > { %v341_v44 = vpack.c.bf16 %v333_v42, %v333_v42  ;;  %v340_v45 = vpack.c.bf16 %v332_v43, %v332_v43  ;;  %v1802_v46 = vpack.i.bf16 %v2057_v32, %v2060_v33  ;;  %v2094_v55 = vpack.i.bf16 %v2071_v38, %v2074_v39 }
  0xa4   : > { %354 = vst.msk [vmem:[#allocation2 + $0x1c] sm:$0xf] %vm346_vm3, %v345_v40  ;;  %v1789_v47 = vpop.permute.xlu0 %1788  ;;  %v361_v9 = vpack.c.bf16 %v2060_v33, %v2060_v33  ;;  %v358_v10 = vpack.c.bf16 %v2071_v38, %v2071_v38  ;;  %v362_v11 = vpack.c.bf16 %v2057_v32, %v2057_v32  ;;  %v357_v13 = vpack.c.bf16 %v2074_v39, %v2074_v39 }
  0xa5   : > { %353 = vst.msk [vmem:[#allocation2 + $0x18] sm:$0xf] %vm346_vm3, %v344_v41  ;;  %1803 = vrot.lane.b32.xlu0 %v1802_v46, %s1959_s8  ;;  %1808 = vrot.lane.b32.xlu1 %v1802_v46, %s1960_s9  ;;  %v1791_v48 = vunpack.i.h.bf16 %v1789_v47  ;;  %v1790_v49 = vunpack.i.l.bf16 %v1789_v47  ;;  %v1799_v50 = vpop.permute.xlu1 %1798 }
  0xa6   : > { %350 = vst.msk [vmem:[#allocation2 + $0xc] sm:$0xf] %vm346_vm3, %v341_v44  ;;  %v1801_v51 = vunpack.i.h.bf16 %v1799_v50  ;;  %v1800_v52 = vunpack.i.l.bf16 %v1799_v50 }
  0xa7   : > { %349 = vst.msk [vmem:[#allocation2 + $0x8] sm:$0xf] %vm346_vm3, %v340_v45  ;;  %v300_v53 = vsel %vm294_vm0, 0.0, %v1791_v48  ;;  %v299_v54 = vsel %vm294_vm0, 0.0, %v1790_v49 }
  0xa8   : > { %v309_v56 = vsel %vm303_vm1, %v300_v53, 0.0  ;;  %v308_v57 = vsel %vm303_vm1, %v299_v54, 0.0  ;;  %v296_v58 = vsel %vm294_vm0, 0.0, %v1801_v51  ;;  %v295_v59 = vsel %vm294_vm0, 0.0, %v1800_v52 }
  0xa9   : > { %v335_v60 = vsel %vm2050_vm2, %v309_v56, 0.0  ;;  %v334_v61 = vsel %vm2050_vm2, %v308_v57, 0.0  ;;  %v305_v62 = vsel %vm303_vm1, %v296_v58, 0.0  ;;  %v304_v63 = vsel %vm303_vm1, %v295_v59, 0.0 }
  0xaa   : > { %v343_v0 = vpack.c.bf16 %v335_v60, %v335_v60  ;;  %v342_v1 = vpack.c.bf16 %v334_v61, %v334_v61  ;;  %v331_v2 = vsel %vm2050_vm2, %v305_v62, 0.0  ;;  %v330_v3 = vsel %vm2050_vm2, %v304_v63, 0.0 }
  0xab   : > { %v339_v4 = vpack.c.bf16 %v331_v2, %v331_v2  ;;  %v338_v5 = vpack.c.bf16 %v330_v3, %v330_v3  ;;  %v1812_v6 = vpack.i.bf16 %v309_v56, %v308_v57  ;;  %v2110_v7 = vpack.i.bf16 %v305_v62, %v304_v63 }
  0xac   : > { %352 = vst.msk [vmem:[#allocation2 + $0x14] sm:$0xf] %vm346_vm3, %v343_v0  ;;  %v359_v8 = vpack.c.bf16 %v308_v57, %v308_v57  ;;  %v360_v12 = vpack.c.bf16 %v309_v56, %v309_v56  ;;  %v355_v14 = vpack.c.bf16 %v304_v63, %v304_v63  ;;  %v356_v15 = vpack.c.bf16 %v305_v62, %v305_v62 }
  0xad   : > { %351 = vst.msk [vmem:[#allocation2 + $0x10] sm:$0xf] %vm346_vm3, %v342_v1  ;;  %1813 = vrot.lane.b32.xlu2 %v1812_v6, %s1959_s8  ;;  %1823 = vrot.lane.b32.xlu0 %v2094_v55, %s1959_s8 }
  0xae   : > { %348 = vst.msk [vmem:[#allocation2 + $0x4] sm:$0xf] %vm346_vm3, %v339_v4  ;;  %1833 = vrot.lane.b32.xlu1 %v2110_v7, %s1959_s8 }
  0xaf   : > { %347 = vst.msk [vmem:[#allocation2] sm:$0xf] %vm346_vm3, %v338_v5 }
  0xb5   : > { %1818 = vrot.lane.b32.xlu2 %v1812_v6, %s1960_s9  ;;  %1828 = vrot.lane.b32.xlu0 %v2094_v55, %s1960_s9 }
  0xb6   : > { %1838 = vrot.lane.b32.xlu1 %v2110_v7, %s1960_s9 }
  0xbd   : > { %1853 = vrot.lane.b32.xlu2 %v1812_v6, %s1961_s18  ;;  %1863 = vrot.lane.b32.xlu0 %v2094_v55, %s1961_s18 }
  0xbe   : > { %1843 = vrot.lane.b32.xlu1 %v1802_v46, %s1961_s18 }
  0xc5   : > { %1858 = vrot.lane.b32.xlu2 %v1812_v6, %s1962_s19  ;;  %379 = vrot.lane.b32.xlu0 %v359_v8, %s1963_s20 }
  0xc6   : > { %1848 = vrot.lane.b32.xlu1 %v1802_v46, %s1962_s19 }
  0xcd   : > { %383 = vrot.lane.b32.xlu2 %v361_v9, %s1963_s20  ;;  %377 = vrot.lane.b32.xlu0 %v358_v10, %s1963_s20 }
  0xce   : > { %1868 = vrot.lane.b32.xlu1 %v1802_v46, %s1964_s21 }
  0xd5   : > { %385 = vrot.lane.b32.xlu2 %v362_v11, %s1963_s20  ;;  %649 = vrot.lane.b32.xlu0 %v361_v9, %s1965_s23 }
  0xd6   : > { %381 = vrot.lane.b32.xlu1 %v360_v12, %s1963_s20 }
  0xdd   : > { %1883 = vrot.lane.b32.xlu0 %v1812_v6, %s1964_s21  ;;  %375 = vrot.lane.b32.xlu2 %v357_v13, %s1963_s20 }
  0xde   : > { %371 = vrot.lane.b32.xlu1 %v355_v14, %s1963_s20 }
  0xe5   : > { %643 = vrot.lane.b32.xlu0 %v358_v10, %s1965_s23  ;;  %373 = vrot.lane.b32.xlu2 %v356_v15, %s1963_s20 }
  0xe6   : > { %651 = vrot.lane.b32.xlu1 %v362_v11, %s1965_s23 }
  0xed   : > { %639 = vrot.lane.b32.xlu0 %v356_v15, %s1965_s23  ;;  %1878 = vrot.lane.b32.xlu2 %v2110_v7, %s1961_s18 }
  0xee   : > { %645 = vrot.lane.b32.xlu1 %v359_v8, %s1965_s23 }
  0xf5   : > { %523 = vrot.lane.b32.xlu0 %v362_v11, %s1966_s24  ;;  %647 = vrot.lane.b32.xlu2 %v360_v12, %s1965_s23 }
  0xf6   : > { %1873 = vrot.lane.b32.xlu1 %v2094_v55, %s1962_s19 }
  0xfd   : > { %517 = vrot.lane.b32.xlu0 %v359_v8, %s1966_s24  ;;  %641 = vrot.lane.b32.xlu2 %v357_v13, %s1965_s23 }
  0xfe   : > { %519 = vrot.lane.b32.xlu1 %v360_v12, %s1966_s24 }
 0x105   : > { %515 = vrot.lane.b32.xlu0 %v358_v10, %s1966_s24  ;;  %637 = vrot.lane.b32.xlu2 %v355_v14, %s1965_s23 }
 0x106   : > { %509 = vrot.lane.b32.xlu1 %v355_v14, %s1966_s24 }
 0x107   : > { %v1814_v17 = vpop.permute.xlu2 %1813 }
 0x108   : > { %v1816_v18 = vunpack.i.h.bf16 %v1814_v17  ;;  %v1815_v19 = vunpack.i.l.bf16 %v1814_v17 }
 0x10a   : > { %v570_v20 = vsel %vm2153_vm4, %v1816_v18, 0.0  ;;  %v569_v23 = vsel %vm2153_vm4, %v1815_v19, 0.0 }
 0x10b   : > { %v578_v24 = vpack.c.bf16 %v570_v20, %v570_v20  ;;  %v577_v25 = vpack.c.bf16 %v569_v23, %v569_v23 }
 0x10d   : > { %586 = vst.msk [vmem:[#allocation2 + $0xb4] sm:$0xf] %vm346_vm3, %v578_v24  ;;  %1888 = vrot.lane.b32.xlu0 %v2110_v7, %s1962_s19  ;;  %521 = vrot.lane.b32.xlu2 %v361_v9, %s1966_s24 }
 0x10e   : > { %585 = vst.msk [vmem:[#allocation2 + $0xb0] sm:$0xf] %vm346_vm3, %v577_v25  ;;  %1893 = vrot.lane.b32.xlu1 %v2094_v55, %s1964_s21 }
 0x10f   : > { %v1819_v21 = vpop.permute.xlu2 %1818 }
 0x110   : > { %v1821_v22 = vunpack.i.h.bf16 %v1819_v21  ;;  %v1820_v26 = vunpack.i.l.bf16 %v1819_v21 }
 0x112   : > { %v490_v28 = vsel %vm2050_vm2, %v1821_v22, 0.0  ;;  %v489_v29 = vsel %vm2050_vm2, %v1820_v26, 0.0 }
 0x113   : > { %v498_v30 = vpack.c.bf16 %v490_v28, %v490_v28  ;;  %v497_v31 = vpack.c.bf16 %v489_v29, %v489_v29 }
 0x115   : > { %506 = vst.msk [vmem:[#allocation2 + $0x74] sm:$0xf] %vm346_vm3, %v498_v30  ;;  %513 = vrot.lane.b32.xlu2 %v357_v13, %s1966_s24 }
 0x116   : > { %505 = vst.msk [vmem:[#allocation2 + $0x70] sm:$0xf] %vm346_vm3, %v497_v31 }
 0x117   : > { %v1804_v32 = vpop.permute.xlu0 %1803  ;;  %v1854_v33 = vpop.permute.xlu2 %1853 }
 0x118   : > { %v1806_v34 = vunpack.i.h.bf16 %v1804_v32  ;;  %v1805_v35 = vunpack.i.l.bf16 %v1804_v32  ;;  %v1856_v36 = vunpack.i.h.bf16 %v1854_v33  ;;  %v1855_v37 = vunpack.i.l.bf16 %v1854_v33  ;;  %v1809_v38 = vpop.permute.xlu1 %1808 }
 0x119   : > { %v1811_v39 = vunpack.i.h.bf16 %v1809_v38  ;;  %v1810_v40 = vunpack.i.l.bf16 %v1809_v38 }
 0x11a   : > { %v572_v41 = vsel %vm2153_vm4, %v1806_v34, 0.0  ;;  %v571_v42 = vsel %vm2153_vm4, %v1805_v35, 0.0  ;;  %v618_v43 = vsel %vm2050_vm2, %v1856_v36, 0.0  ;;  %v617_v44 = vsel %vm2050_vm2, %v1855_v37, 0.0 }
 0x11b   : > { %v580_v45 = vpack.c.bf16 %v572_v41, %v572_v41  ;;  %v579_v46 = vpack.c.bf16 %v571_v42, %v571_v42  ;;  %v626_v47 = vpack.c.bf16 %v618_v43, %v618_v43  ;;  %v625_v48 = vpack.c.bf16 %v617_v44, %v617_v44 }
 0x11c   : > { %v492_v49 = vsel %vm2050_vm2, %v1811_v39, 0.0  ;;  %v491_v50 = vsel %vm2050_vm2, %v1810_v40, 0.0 }
 0x11d   : > { %588 = vst.msk [vmem:[#allocation2 + $0xbc] sm:$0xf] %vm346_vm3, %v580_v45  ;;  %v500_v51 = vpack.c.bf16 %v492_v49, %v492_v49  ;;  %511 = vrot.lane.b32.xlu2 %v356_v15, %s1966_s24  ;;  %v499_v52 = vpack.c.bf16 %v491_v50, %v491_v50 }
 0x11e   : > { %587 = vst.msk [vmem:[#allocation2 + $0xb8] sm:$0xf] %vm346_vm3, %v579_v46 }
 0x11f   : > { %634 = vst.msk [vmem:[#allocation2 + $0xd4] sm:$0xf] %vm346_vm3, %v626_v47  ;;  %v1859_v53 = vpop.permute.xlu2 %1858  ;;  %v1824_v54 = vpop.permute.xlu0 %1823 }
 0x120   : > { %633 = vst.msk [vmem:[#allocation2 + $0xd0] sm:$0xf] %vm346_vm3, %v625_v48  ;;  %v1861_v55 = vunpack.i.h.bf16 %v1859_v53  ;;  %v1860_v56 = vunpack.i.l.bf16 %v1859_v53  ;;  %v1826_v57 = vunpack.i.h.bf16 %v1824_v54  ;;  %v1825_v58 = vunpack.i.l.bf16 %v1824_v54  ;;  %v1834_v59 = vpop.permute.xlu1 %1833 }
 0x121   : > { %508 = vst.msk [vmem:[#allocation2 + $0x7c] sm:$0xf] %vm346_vm3, %v500_v51  ;;  %v1836_v60 = vunpack.i.h.bf16 %v1834_v59  ;;  %v1835_v61 = vunpack.i.l.bf16 %v1834_v59 }
 0x122   : > { %507 = vst.msk [vmem:[#allocation2 + $0x78] sm:$0xf] %vm346_vm3, %v499_v52  ;;  %v442_v62 = vsel %vm2153_vm4, %v1861_v55, 0.0  ;;  %v441_v63 = vsel %vm2153_vm4, %v1860_v56, 0.0  ;;  %v568_v0 = vsel %vm2153_vm4, %v1826_v57, 0.0  ;;  %v567_v1 = vsel %vm2153_vm4, %v1825_v58, 0.0 }
 0x123   : > { %v450_v2 = vpack.c.bf16 %v442_v62, %v442_v62  ;;  %v449_v3 = vpack.c.bf16 %v441_v63, %v441_v63  ;;  %v576_v4 = vpack.c.bf16 %v568_v0, %v568_v0  ;;  %v575_v5 = vpack.c.bf16 %v567_v1, %v567_v1 }
 0x124   : > { %v566_v6 = vsel %vm2153_vm4, %v1836_v60, 0.0  ;;  %v565_v8 = vsel %vm2153_vm4, %v1835_v61, 0.0 }
 0x125   : > { %458 = vst.msk [vmem:[#allocation2 + $0x54] sm:$0xf] %vm346_vm3, %v450_v2  ;;  %v574_v9 = vpack.c.bf16 %v566_v6, %v566_v6  ;;  %1898 = vrot.lane.b32.xlu2 %v2110_v7, %s1964_s21  ;;  %v573_v10 = vpack.c.bf16 %v565_v8, %v565_v8 }
 0x126   : > { %457 = vst.msk [vmem:[#allocation2 + $0x50] sm:$0xf] %vm346_vm3, %v449_v3 }
 0x127   : > { %584 = vst.msk [vmem:[#allocation2 + $0xac] sm:$0xf] %vm346_vm3, %v576_v4  ;;  %v384_v11 = vpop.permute.xlu2 %383  ;;  %v1829_v12 = vpop.permute.xlu0 %1828 }
 0x128   : > { %583 = vst.msk [vmem:[#allocation2 + $0xa8] sm:$0xf] %vm346_vm3, %v575_v5  ;;  %v1831_v13 = vunpack.i.h.bf16 %v1829_v12  ;;  %v1830_v14 = vunpack.i.l.bf16 %v1829_v12  ;;  %v1839_v15 = vpop.permute.xlu1 %1838 }
 0x129   : > { %582 = vst.msk [vmem:[#allocation2 + $0xa4] sm:$0xf] %vm346_vm3, %v574_v9  ;;  %v1841_v17 = vunpack.i.h.bf16 %v1839_v15  ;;  %v1840_v18 = vunpack.i.l.bf16 %v1839_v15 }
 0x12a   : > { %581 = vst.msk [vmem:[#allocation2 + $0xa0] sm:$0xf] %vm346_vm3, %v573_v10  ;;  %v488_v7 = vsel %vm2050_vm2, %v1831_v13, 0.0  ;;  %v487_v19 = vsel %vm2050_vm2, %v1830_v14, 0.0 }
 0x12b   : > { %401 = vst.msk [vmem:[#allocation2 + $0x38] sm:$0xf] %vm346_vm3, %v384_v11  ;;  %v496_v20 = vpack.c.bf16 %v488_v7, %v488_v7  ;;  %v495_v23 = vpack.c.bf16 %v487_v19, %v487_v19  ;;  %v486_v24 = vsel %vm2050_vm2, %v1841_v17, 0.0  ;;  %v485_v25 = vsel %vm2050_vm2, %v1840_v18, 0.0 }
 0x12c   : > { %v494_v21 = vpack.c.bf16 %v486_v24, %v486_v24  ;;  %v493_v22 = vpack.c.bf16 %v485_v25, %v485_v25 }
 0x12d   : > { %504 = vst.msk [vmem:[#allocation2 + $0x6c] sm:$0xf] %vm346_vm3, %v496_v20 }
 0x12e   : > { %503 = vst.msk [vmem:[#allocation2 + $0x68] sm:$0xf] %vm346_vm3, %v495_v23  ;;  %v1667_v23 = vld [vmem:[#allocation2 + $0x18] sm:$0xff] }
 0x12f   : > { %502 = vst.msk [vmem:[#allocation2 + $0x64] sm:$0xf] %vm346_vm3, %v494_v21  ;;  %v386_v26 = vpop.permute.xlu2 %385  ;;  %v1864_v28 = vpop.permute.xlu0 %1863 }
 0x130   : > { %501 = vst.msk [vmem:[#allocation2 + $0x60] sm:$0xf] %vm346_vm3, %v493_v22  ;;  %v1866_v29 = vunpack.i.h.bf16 %v1864_v28  ;;  %v1865_v30 = vunpack.i.l.bf16 %v1864_v28  ;;  %v1844_v31 = vpop.permute.xlu1 %1843  ;;  %v1666_v22 = vld [vmem:[#allocation2 + $0x10] sm:$0xff]  ;;  %v1665_v28 = vld [vmem:[#allocation2 + $0x8] sm:$0xff] }
 0x131   : > { %402 = vst.msk [vmem:[#allocation2 + $0x3c] sm:$0xf] %vm346_vm3, %v386_v26  ;;  %v1846_v32 = vunpack.i.h.bf16 %v1844_v31  ;;  %v1845_v33 = vunpack.i.l.bf16 %v1844_v31  ;;  %v1476_v31 = vld [vmem:[%s2286_s28 + $0x78] sm:$0xf] }
 0x132   : > { %v616_v34 = vsel %vm2050_vm2, %v1866_v29, 0.0  ;;  %v615_v35 = vsel %vm2050_vm2, %v1865_v30, 0.0  ;;  %v1436_v29 = vld [vmem:[%s2286_s28 + $0x28] sm:$0xf]  ;;  %v1651_v30 = vld [vmem:[%s2286_s28 + $0x38] sm:$0xf0] }
 0x133   : > { %v624_v36 = vpack.c.bf16 %v616_v34, %v616_v34  ;;  %v623_v37 = vpack.c.bf16 %v615_v35, %v615_v35  ;;  %v620_v38 = vsel %vm2050_vm2, %v1846_v32, 0.0  ;;  %v619_v39 = vsel %vm2050_vm2, %v1845_v33, 0.0  ;;  %v1661_v34 = vld [vmem:[%s2286_s28 + $0x88] sm:$0xf0]  ;;  %v1416_v35 = vld [vmem:[%s2286_s28] sm:$0xf] }
 0x134   : > { %v628_v40 = vpack.c.bf16 %v620_v38, %v620_v38  ;;  %v627_v41 = vpack.c.bf16 %v619_v39, %v619_v39  ;;  %v1664_v38 = vld [vmem:[#allocation2] sm:$0xff] }
 0x135   : > { %632 = vst.msk [vmem:[#allocation2 + $0xcc] sm:$0xf] %vm346_vm3, %v624_v36  ;;  %v1646_v36 = vld [vmem:[%s2286_s28 + $0x10] sm:$0xf0] }
 0x136   : > { %631 = vst.msk [vmem:[#allocation2 + $0xc8] sm:$0xf] %vm346_vm3, %v623_v37 }
 0x137   : > { %636 = vst.msk [vmem:[#allocation2 + $0xdc] sm:$0xf] %vm346_vm3, %v628_v40  ;;  %v380_v42 = vpop.permute.xlu0 %379  ;;  %v376_v43 = vpop.permute.xlu2 %375 }
 0x138   : > { %635 = vst.msk [vmem:[#allocation2 + $0xd8] sm:$0xf] %vm346_vm3, %v627_v41  ;;  %v1849_v44 = vpop.permute.xlu1 %1848  ;;  %v1671_v45 = vld [vmem:[#allocation2 + $0x38] sm:$0xff] }
 0x139   : > { %399 = vst.msk [vmem:[#allocation2 + $0x30] sm:$0xf] %vm346_vm3, %v380_v42  ;;  %v1851_v46 = vunpack.i.h.bf16 %v1849_v44  ;;  %v1850_v47 = vunpack.i.l.bf16 %v1849_v44  ;;  %1142 = vmatpush.bf16.msra.mxu0 %v1671_v45  ;;  %1700 = vmatpush.bf16.msra.mxu1 %v1671_v45  ;;  %v1437_v42 = vor.u32 %v1651_v30, %v1436_v29  ;;  %v1687_v44 = vld [vmem:[#allocation2 + $0xb8] sm:$0xff] }
 0x13a   : > { %397 = vst.msk [vmem:[#allocation2 + $0x28] sm:$0xf] %vm346_vm3, %v376_v43  ;;  %1701 = vmatpush.bf16.msra.mxu2 %v1671_v45  ;;  %v1679_v43 = vld [vmem:[#allocation2 + $0x78] sm:$0xff]  ;;  %v1477_v45 = vor.u32 %v1661_v34, %v1476_v31 }
 0x13b   : > { %v444_v48 = vsel %vm2153_vm4, %v1851_v46, 0.0  ;;  %v443_v49 = vsel %vm2153_vm4, %v1850_v47, 0.0  ;;  %v1417_v46 = vor.u32 %v1646_v36, %v1416_v35 }
 0x13c   : > { %v452_v50 = vpack.c.bf16 %v444_v48, %v444_v48  ;;  %v451_v51 = vpack.c.bf16 %v443_v49, %v443_v49 }
 0x13e   : > { %460 = vst.msk [vmem:[#allocation2 + $0x5c] sm:$0xf] %vm346_vm3, %v452_v50 }
 0x13f   : > { %459 = vst.msk [vmem:[#allocation2 + $0x58] sm:$0xf] %vm346_vm3, %v451_v51  ;;  %v378_v52 = vpop.permute.xlu0 %377  ;;  %v374_v53 = vpop.permute.xlu2 %373 }
 0x140   : > { %398 = vst.msk [vmem:[#allocation2 + $0x2c] sm:$0xf] %vm346_vm3, %v378_v52  ;;  %v1869_v54 = vpop.permute.xlu1 %1868 }
 0x141   : > { %396 = vst.msk [vmem:[#allocation2 + $0x24] sm:$0xf] %vm346_vm3, %v374_v53  ;;  %v1871_v55 = vunpack.i.h.bf16 %v1869_v54  ;;  %v1870_v56 = vunpack.i.l.bf16 %v1869_v54  ;;  %v1678_v53 = vld [vmem:[#allocation2 + $0x70] sm:$0xff] }
 0x142   : > { %v1686_v54 = vld [vmem:[#allocation2 + $0xb0] sm:$0xff] }
 0x143   : > { %v700_v57 = vsel %vm2153_vm4, %v1871_v55, 0.0  ;;  %v699_v58 = vsel %vm2153_vm4, %v1870_v56, 0.0 }
 0x144   : > { %v708_v59 = vpack.c.bf16 %v700_v57, %v700_v57  ;;  %v707_v60 = vpack.c.bf16 %v699_v58, %v699_v58 }
 0x146   : > { %716 = vst.msk [vmem:[#allocation2 + $0x11c] sm:$0xf] %vm346_vm3, %v708_v59 }
 0x147   : > { %715 = vst.msk [vmem:[#allocation2 + $0x118] sm:$0xf] %vm346_vm3, %v707_v60  ;;  %v650_v61 = vpop.permute.xlu0 %649  ;;  %v1879_v62 = vpop.permute.xlu2 %1878  ;;  %v1669_v17 = vld [vmem:[#allocation2 + $0x28] sm:$0xff] }
 0x148   : > { %667 = vst.msk [vmem:[#allocation2 + $0xf8] sm:$0xf] %vm346_vm3, %v650_v61  ;;  %v1881_v63 = vunpack.i.h.bf16 %v1879_v62  ;;  %v1880_v0 = vunpack.i.l.bf16 %v1879_v62  ;;  %v382_v1 = vpop.permute.xlu1 %381  ;;  %v1677_v60 = vld [vmem:[#allocation2 + $0x68] sm:$0xff]  ;;  %v1691_v62 = vld [vmem:[#allocation2 + $0xd8] sm:$0xff] }
 0x149   : > { %400 = vst.msk [vmem:[#allocation2 + $0x34] sm:$0xf] %vm346_vm3, %v382_v1  ;;  %v1685_v61 = vld [vmem:[#allocation2 + $0xa8] sm:$0xff]  ;;  %v1456_v1 = vld [vmem:[%s2286_s28 + $0x50] sm:$0xf] }
 0x14a   : > { %v614_v2 = vsel %vm2050_vm2, %v1881_v63, 0.0  ;;  %v613_v3 = vsel %vm2050_vm2, %v1880_v0, 0.0  ;;  %v1684_v63 = vld [vmem:[#allocation2 + $0xa0] sm:$0xff] }
 0x14b   : > { %v622_v4 = vpack.c.bf16 %v614_v2, %v614_v2  ;;  %v621_v5 = vpack.c.bf16 %v613_v3, %v613_v3  ;;  %v1676_v0 = vld [vmem:[#allocation2 + $0x60] sm:$0xff] }
 0x14c   : > { %v1656_v2 = vld [vmem:[%s2286_s28 + $0x60] sm:$0xf0] }
 0x14d   : > { %630 = vst.msk [vmem:[#allocation2 + $0xc4] sm:$0xf] %vm346_vm3, %v622_v4 }
 0x14e   : > { %629 = vst.msk [vmem:[#allocation2 + $0xc0] sm:$0xf] %vm346_vm3, %v621_v5  ;;  %v1699_v49 = vld [vmem:[#allocation2 + $0x118] sm:$0xff] }
 0x14f   : > { %v1884_v6 = vpop.permute.xlu0 %1883  ;;  %v648_v8 = vpop.permute.xlu2 %647 }
 0x150   : > { %v1886_v9 = vunpack.i.h.bf16 %v1884_v6  ;;  %v1885_v10 = vunpack.i.l.bf16 %v1884_v6  ;;  %666 = vst.msk [vmem:[#allocation2 + $0xf4] sm:$0xf] %vm346_vm3, %v648_v8  ;;  %v372_v11 = vpop.permute.xlu1 %371  ;;  %v1670_v12 = vld [vmem:[#allocation2 + $0x30] sm:$0xff]  ;;  %v1457_v8 = vor.u32 %v1656_v2, %v1456_v1  ;;  %v1452_v1 = vld [vmem:[%s2286_s28 + $0x38] sm:$0xf] }
 0x151   : > { %395 = vst.msk [vmem:[#allocation2 + $0x20] sm:$0xf] %vm346_vm3, %v372_v11  ;;  %1143 = vmatpush.bf16.msra.mxu0 %v1670_v12  ;;  %1702 = vmatpush.bf16.msra.mxu1 %v1670_v12  ;;  %v1690_v6 = vld [vmem:[#allocation2 + $0xd0] sm:$0xff]  ;;  %v1689_v11 = vld [vmem:[#allocation2 + $0xc8] sm:$0xff] }
 0x152   : > { %v698_v27 = vsel %vm2153_vm4, %v1886_v9, 0.0  ;;  %v697_v13 = vsel %vm2153_vm4, %v1885_v10, 0.0  ;;  %1703 = vmatpush.bf16.msra.mxu2 %v1670_v12  ;;  %v1675_v9 = vld [vmem:[#allocation2 + $0x58] sm:$0xff]  ;;  %v1674_v12 = vld [vmem:[#allocation2 + $0x50] sm:$0xff]  ;;  %v1653_v2 = vld [vmem:[%s2286_s28 + $0x48] sm:$0xf0] }
 0x153   : > { %v706_v14 = vpack.c.bf16 %v698_v27, %v698_v27  ;;  %v705_v15 = vpack.c.bf16 %v697_v13, %v697_v13  ;;  %v1645_v13 = vld [vmem:[%s2286_s28 + $0xc] sm:$0xf] }
 0x155   : > { %714 = vst.msk [vmem:[#allocation2 + $0x114] sm:$0xf] %vm346_vm3, %v706_v14  ;;  %1144 = vmatpush.bf16.msra.mxu0 %v1669_v17  ;;  %1704 = vmatpush.bf16.msra.mxu1 %v1669_v17  ;;  %v1426_v14 = vld [vmem:[%s2286_s28 + $0x1c] sm:$0xf0] }
 0x156   : > { %713 = vst.msk [vmem:[#allocation2 + $0x110] sm:$0xf] %vm346_vm3, %v705_v15  ;;  %1705 = vmatpush.bf16.msra.mxu2 %v1669_v17 }
 0x157   : > { %v644_v18 = vpop.permute.xlu0 %643  ;;  %v642_v7 = vpop.permute.xlu2 %641 }
 0x158   : > { %664 = vst.msk [vmem:[#allocation2 + $0xec] sm:$0xf] %vm346_vm3, %v644_v18  ;;  %v652_v19 = vpop.permute.xlu1 %651  ;;  %v1668_v20 = vld [vmem:[#allocation2 + $0x20] sm:$0xff] }
 0x159   : > { %663 = vst.msk [vmem:[#allocation2 + $0xe8] sm:$0xf] %vm346_vm3, %v642_v7  ;;  %1145 = vmatpush.bf16.msra.mxu0 %v1668_v20  ;;  %1706 = vmatpush.bf16.msra.mxu1 %v1668_v20 }
 0x15a   : > { %668 = vst.msk [vmem:[#allocation2 + $0xfc] sm:$0xf] %vm346_vm3, %v652_v19  ;;  %1707 = vmatpush.bf16.msra.mxu2 %v1668_v20 }
 0x15d   : > { %1146 = vmatpush.bf16.msra.mxu0 %v1667_v23  ;;  %1708 = vmatpush.bf16.msra.mxu1 %v1667_v23  ;;  %v1698_v57 = vld [vmem:[#allocation2 + $0x110] sm:$0xff] }
 0x15e   : > { %1709 = vmatpush.bf16.msra.mxu2 %v1667_v23 }
 0x15f   : > { %v640_v24 = vpop.permute.xlu0 %639  ;;  %v638_v25 = vpop.permute.xlu2 %637 }
 0x160   : > { %662 = vst.msk [vmem:[#allocation2 + $0xe4] sm:$0xf] %vm346_vm3, %v640_v24  ;;  %v646_v21 = vpop.permute.xlu1 %645  ;;  %v1693_v52 = vld [vmem:[#allocation2 + $0xe8] sm:$0xff] }
 0x161   : > { %661 = vst.msk [vmem:[#allocation2 + $0xe0] sm:$0xf] %vm346_vm3, %v638_v25  ;;  %v1695_v26 = vld [vmem:[#allocation2 + $0xf8] sm:$0xff]  ;;  %1147 = vmatpush.bf16.msra.mxu0 %v1666_v22  ;;  %1710 = vmatpush.bf16.msra.mxu1 %v1666_v22 }
 0x162   : > { %665 = vst.msk [vmem:[#allocation2 + $0xf0] sm:$0xf] %vm346_vm3, %v646_v21  ;;  %1711 = vmatpush.bf16.msra.mxu2 %v1666_v22  ;;  %1229 = vmatpush.bf16.msra.mxu3 %v1695_v26  ;;  %v1688_v22 = vld [vmem:[#allocation2 + $0xc0] sm:$0xff]  ;;  %v1429_v26 = vor.u32 %v1645_v13, %v1426_v14  ;;  %v1658_v14 = vld [vmem:[%s2286_s28 + $0x70] sm:$0xf0] }
 0x163   : > { %v1472_v13 = vld [vmem:[%s2286_s28 + $0x60] sm:$0xf] }
 0x165   : > { %1148 = vmatpush.bf16.msra.mxu0 %v1665_v28  ;;  %1712 = vmatpush.bf16.msra.mxu1 %v1665_v28 }
 0x166   : > { %1713 = vmatpush.bf16.msra.mxu2 %v1665_v28 }
 0x167   : > { %v524_v32 = vpop.permute.xlu0 %523  ;;  %v522_v33 = vpop.permute.xlu2 %521 }
 0x168   : > { %540 = vst.msk [vmem:[#allocation2 + $0x9c] sm:$0xf] %vm346_vm3, %v524_v32  ;;  %v1874_v37 = vpop.permute.xlu1 %1873  ;;  %v1692_v59 = vld [vmem:[#allocation2 + $0xe0] sm:$0xff] }
 0x169   : > { %539 = vst.msk [vmem:[#allocation2 + $0x98] sm:$0xf] %vm346_vm3, %v522_v33  ;;  %v1876_v39 = vunpack.i.h.bf16 %v1874_v37  ;;  %v1875_v40 = vunpack.i.l.bf16 %v1874_v37  ;;  %v1694_v41 = vld [vmem:[#allocation2 + $0xf0] sm:$0xff]  ;;  %1149 = vmatpush.bf16.msra.mxu0 %v1664_v38  ;;  %1714 = vmatpush.bf16.msra.mxu1 %v1664_v38 }
 0x16a   : > { %1715 = vmatpush.bf16.msra.mxu2 %v1664_v38  ;;  %1230 = vmatpush.bf16.msra.mxu3 %v1694_v41 }
 0x16b   : > { %v440_v47 = vsel %vm2153_vm4, %v1876_v39, 0.0  ;;  %v439_v48 = vsel %vm2153_vm4, %v1875_v40, 0.0  ;;  %v1424_v39 = vld [vmem:[%s2286_s28 + $0x8] sm:$0xf]  ;;  %v1647_v40 = vld [vmem:[%s2286_s28 + $0x18] sm:$0xf0] }
 0x16c   : > { %v448_v50 = vpack.c.bf16 %v440_v47, %v440_v47  ;;  %v447_v51 = vpack.c.bf16 %v439_v48, %v439_v48  ;;  %1155 = vmatmul.bf16.vlgmr.msra.gmra.mxu1 %v1437_v42  ;;  %1150 = vmatmul.bf16.vlgmr.msra.gmra.mxu0 %v1417_v46  ;;  %v1425_v16 = vor.u32 %v1647_v40, %v1424_v39  ;;  %v1650_v48 = vld [vmem:[%s2286_s28 + $0x34] sm:$0xf] }
 0x16d   : > { %1171 = vmatpush.bf16.msrb.mxu1 %v1679_v43  ;;  %1262 = vmatpush.bf16.msrb.mxu0 %v1699_v49  ;;  %v1446_v49 = vld [vmem:[%s2286_s28 + $0x44] sm:$0xf0] }
 0x16e   : > { %1200 = vmatpush.bf16.msrb.mxu2 %v1687_v44  ;;  %456 = vst.msk [vmem:[#allocation2 + $0x4c] sm:$0xf] %vm346_vm3, %v448_v50  ;;  %1231 = vmatpush.bf16.msra.mxu3 %v1693_v52  ;;  %v1644_v44 = vld [vmem:[%s2286_s28 + $0x4] sm:$0xf]  ;;  %v1432_v52 = vld [vmem:[%s2286_s28 + $0x10] sm:$0xf] }
 0x16f   : > { %1165 = vmatmul.bf16.vlgmr.msra.gmra.mxu2 %v1477_v45  ;;  %455 = vst.msk [vmem:[#allocation2 + $0x48] sm:$0xf] %vm346_vm3, %v447_v51  ;;  %v518_v55 = vpop.permute.xlu0 %517  ;;  %v514_v56 = vpop.permute.xlu2 %513  ;;  %v1418_v45 = vld [vmem:[%s2286_s28 + $0x14] sm:$0xf0]  ;;  %v1449_v51 = vor.u32 %v1650_v48, %v1446_v49 }
 0x170   : > { %537 = vst.msk [vmem:[#allocation2 + $0x90] sm:$0xf] %vm346_vm3, %v518_v55  ;;  %v520_v58 = vpop.permute.xlu1 %519  ;;  %v1683_v10 = vld [vmem:[#allocation2 + $0x98] sm:$0xff]  ;;  %v1421_v47 = vor.u32 %v1644_v44, %v1418_v45  ;;  %v1652_v55 = vld [vmem:[%s2286_s28 + $0x40] sm:$0xf0] }
 0x171   : > { %1172 = vmatpush.bf16.msrb.mxu1 %v1678_v53  ;;  %535 = vst.msk [vmem:[#allocation2 + $0x88] sm:$0xf] %vm346_vm3, %v514_v56  ;;  %1263 = vmatpush.bf16.msrb.mxu0 %v1698_v57  ;;  %v1648_v53 = vld [vmem:[%s2286_s28 + $0x20] sm:$0xf0] }
 0x172   : > { %1201 = vmatpush.bf16.msrb.mxu2 %v1686_v54  ;;  %538 = vst.msk [vmem:[#allocation2 + $0x94] sm:$0xf] %vm346_vm3, %v520_v58  ;;  %1232 = vmatpush.bf16.msra.mxu3 %v1692_v59  ;;  %v1444_v54 = vld [vmem:[%s2286_s28 + $0x30] sm:$0xf]  ;;  %v1433_v57 = vor.u32 %v1648_v53, %v1432_v52  ;;  %v1649_v59 = vld [vmem:[%s2286_s28 + $0x2c] sm:$0xf] }
 0x173   : > { %v1445_v58 = vor.u32 %v1652_v55, %v1444_v54 }
 0x175   : > { %1173 = vmatpush.bf16.msrb.mxu1 %v1677_v60  ;;  %v1438_v60 = vld [vmem:[%s2286_s28 + $0x3c] sm:$0xf0] }
 0x176   : > { %1202 = vmatpush.bf16.msrb.mxu2 %v1685_v61  ;;  %1233 = vmatpush.bf16.msra.mxu3 %v1691_v62  ;;  %v1673_v32 = vld [vmem:[#allocation2 + $0x48] sm:$0xff]  ;;  %v1441_v61 = vor.u32 %v1649_v59, %v1438_v60  ;;  %v1655_v62 = vld [vmem:[%s2286_s28 + $0x5c] sm:$0xf] }
 0x177   : > { %v516_v3 = vpop.permute.xlu0 %515  ;;  %v512_v4 = vpop.permute.xlu2 %511 }
 0x178   : > { %536 = vst.msk [vmem:[#allocation2 + $0x8c] sm:$0xf] %vm346_vm3, %v516_v3  ;;  %v510_v5 = vpop.permute.xlu1 %509  ;;  %v1464_v3 = vld [vmem:[%s2286_s28 + $0x58] sm:$0xf] }
 0x179   : > { %1174 = vmatpush.bf16.msrb.mxu1 %v1676_v0  ;;  %534 = vst.msk [vmem:[#allocation2 + $0x84] sm:$0xf] %vm346_vm3, %v512_v4  ;;  %v1682_v27 = vld [vmem:[#allocation2 + $0x90] sm:$0xff]  ;;  %v1657_v4 = vld [vmem:[%s2286_s28 + $0x68] sm:$0xf0] }
 0x17a   : > { %1203 = vmatpush.bf16.msrb.mxu2 %v1684_v63  ;;  %533 = vst.msk [vmem:[#allocation2 + $0x80] sm:$0xf] %vm346_vm3, %v510_v5  ;;  %1234 = vmatpush.bf16.msra.mxu3 %v1690_v6  ;;  %v1466_v63 = vld [vmem:[%s2286_s28 + $0x6c] sm:$0xf0]  ;;  %v1453_v5 = vor.u32 %v1653_v2, %v1452_v1  ;;  %v1465_v6 = vor.u32 %v1657_v4, %v1464_v3 }
 0x17b   : > { %v1469_v0 = vor.u32 %v1655_v62, %v1466_v63 }
 0x17c   : > { %1160 = vmatmul.bf16.gmra.mxu1 %v1457_v8  ;;  %v1654_v8 = vld [vmem:[%s2286_s28 + $0x54] sm:$0xf] }
 0x17d   : > { %1175 = vmatpush.bf16.msrb.mxu1 %v1675_v9  ;;  %v1458_v9 = vld [vmem:[%s2286_s28 + $0x64] sm:$0xf0] }
 0x17e   : > { %1204 = vmatpush.bf16.msrb.mxu2 %v1683_v10  ;;  %1235 = vmatpush.bf16.msra.mxu3 %v1689_v11  ;;  %v1461_v10 = vor.u32 %v1654_v8, %v1458_v9  ;;  %v1660_v11 = vld [vmem:[%s2286_s28 + $0x84] sm:$0xf] }
 0x17f   : > { %v1889_v15 = vpop.permute.xlu0 %1888  ;;  %v1899_v17 = vpop.permute.xlu2 %1898  ;;  %v1681_v24 = vld [vmem:[#allocation2 + $0x88] sm:$0xff] }
 0x180   : > { %v1891_v18 = vunpack.i.h.bf16 %v1889_v15  ;;  %v1890_v7 = vunpack.i.l.bf16 %v1889_v15  ;;  %v1901_v19 = vunpack.i.h.bf16 %v1899_v17  ;;  %v1900_v20 = vunpack.i.l.bf16 %v1899_v17  ;;  %v1894_v23 = vpop.permute.xlu1 %1893  ;;  %v1484_v15 = vld [vmem:[%s2286_s28 + $0x80] sm:$0xf]  ;;  %v1662_v17 = vld [vmem:[%s2286_s28 + $0x90] sm:$0xf0] }
 0x181   : > { %1176 = vmatpush.bf16.msrb.mxu1 %v1674_v12  ;;  %v1896_v25 = vunpack.i.h.bf16 %v1894_v23  ;;  %v1895_v21 = vunpack.i.l.bf16 %v1894_v23  ;;  %v1680_v43 = vld [vmem:[#allocation2 + $0x80] sm:$0xff]  ;;  %v1486_v12 = vld [vmem:[%s2286_s28 + $0x94] sm:$0xf0] }
 0x182   : > { %1205 = vmatpush.bf16.msrb.mxu2 %v1682_v27  ;;  %v438_v28 = vsel %vm2153_vm4, %v1891_v18, 0.0  ;;  %v437_v29 = vsel %vm2153_vm4, %v1890_v7, 0.0  ;;  %v694_v30 = vsel %vm2153_vm4, %v1901_v19, 0.0  ;;  %v693_v31 = vsel %vm2153_vm4, %v1900_v20, 0.0  ;;  %1236 = vmatpush.bf16.msra.mxu3 %v1688_v22  ;;  %v1659_v19 = vld [vmem:[%s2286_s28 + $0x7c] sm:$0xf] }
 0x183   : > { %v446_v33 = vpack.c.bf16 %v438_v28, %v438_v28  ;;  %v445_v34 = vpack.c.bf16 %v437_v29, %v437_v29  ;;  %v702_v35 = vpack.c.bf16 %v694_v30, %v694_v30  ;;  %v701_v36 = vpack.c.bf16 %v693_v31, %v693_v31  ;;  %v1478_v20 = vld [vmem:[%s2286_s28 + $0x8c] sm:$0xf0] }
 0x184   : > { %v696_v37 = vsel %vm2153_vm4, %v1896_v25, 0.0  ;;  %v695_v38 = vsel %vm2153_vm4, %v1895_v21, 0.0  ;;  %v1489_v27 = vor.u32 %v1660_v11, %v1486_v12  ;;  %v1473_v18 = vor.u32 %v1658_v14, %v1472_v13  ;;  %v1663_v25 = vld [vmem:[%s2286_s28 + $0x98] sm:$0xf0] }
 0x185   : > { %1177 = vmatpush.bf16.msrb.mxu1 %v1673_v32  ;;  %454 = vst.msk [vmem:[#allocation2 + $0x44] sm:$0xf] %vm346_vm3, %v446_v33  ;;  %v704_v41 = vpack.c.bf16 %v696_v37, %v696_v37  ;;  %v703_v42 = vpack.c.bf16 %v695_v38, %v695_v38  ;;  %1237 = vmatmul.bf16.vlgmr.msra.gmra.mxu3 %v1429_v26 }
 0x186   : > { %1206 = vmatpush.bf16.msrb.mxu2 %v1681_v24  ;;  %453 = vst.msk [vmem:[#allocation2 + $0x40] sm:$0xf] %vm346_vm3, %v445_v34  ;;  %v1485_v7 = vor.u32 %v1662_v17, %v1484_v15  ;;  %v1481_v23 = vor.u32 %v1659_v19, %v1478_v20  ;;  %v1492_v24 = vld [vmem:[%s2286_s28 + $0x88] sm:$0xf] }
 0x187   : > { %710 = vst.msk [vmem:[#allocation2 + $0x104] sm:$0xf] %vm346_vm3, %v702_v35  ;;  %v1493_v21 = vor.u32 %v1663_v25, %v1492_v24 }
 0x188   : > { %709 = vst.msk [vmem:[#allocation2 + $0x100] sm:$0xf] %vm346_vm3, %v701_v36 }
 0x189   : > { %712 = vst.msk [vmem:[#allocation2 + $0x10c] sm:$0xf] %vm346_vm3, %v704_v41 }
 0x18a   : > { %1207 = vmatpush.bf16.msrb.mxu2 %v1680_v43  ;;  %711 = vst.msk [vmem:[#allocation2 + $0x108] sm:$0xf] %vm346_vm3, %v703_v42 }
 0x18d   : > { %1208 = vmatmul.bf16.vlgmr.msrb.gmra.mxu2 %v1425_v16  ;;  %v1672_v46 = vld [vmem:[#allocation2 + $0x40] sm:$0xff] }
 0x18e   : > { %1178 = vmatpush.bf16.msrb.mxu1 %v1672_v46 }
 0x18f   : > { %v1696_v56 = vld [vmem:[#allocation2 + $0x100] sm:$0xff] }
 0x191   : > { %v1697_v50 = vld [vmem:[#allocation2 + $0x108] sm:$0xff]  ;;  %1179 = vmatmul.bf16.vlgmr.msrb.gmra.mxu1 %v1421_v47 }
 0x192   : > { %1264 = vmatpush.bf16.msrb.mxu0 %v1697_v50 }
 0x195   : > { %1242 = vmatmul.bf16.gmra.mxu3 %v1449_v51 }
 0x196   : > { %1265 = vmatpush.bf16.msrb.mxu0 %v1696_v56 }
 0x199   : > { %1638 = vmatmul.msk.bf16.vlgmr.msrb.gmra.mxu0 %vm1129_vm5, %v1433_v57 }
 0x19d   : > { %1213 = vmatmul.bf16.gmra.mxu2 %v1445_v58 }
 0x1a1   : > { %1184 = vmatmul.bf16.gmra.mxu1 %v1441_v61 }
 0x1a5   : > { %1247 = vmatmul.bf16.gmra.mxu3 %v1469_v0 }
 0x1a9   : > { %1639 = vmatmul.msk.bf16.gmra.mxu0 %vm1129_vm5, %v1453_v5 }
 0x1ad   : > { %1218 = vmatmul.bf16.gmra.mxu2 %v1465_v6 }
 0x1b1   : > { %1189 = vmatmul.bf16.gmra.mxu1 %v1461_v10 }
 0x1b5   : > { %1252 = vmatmul.bf16.gmra.mxu3 %v1489_v27 }
 0x1b9   : > { %1640 = vmatmul.msk.bf16.gmra.mxu0 %vm1129_vm5, %v1473_v18 }
 0x1bd   : > { %1223 = vmatmul.bf16.gmra.mxu2 %v1485_v7 }
 0x1c1   : > { %1194 = vmatmul.bf16.gmra.mxu1 %v1481_v23 }
 0x1c9   : > { %1641 = vmatmul.msk.bf16.gmra.mxu0 %vm1129_vm5, %v1493_v21 }
 0x1e9   : > { %v1156_v22 = vpop.f32.mrf.mxu1  ;;  %v1151_v30 = vpop.f32.mrf.mxu0 }
 0x1f1   : > { %v1158_v26 = vpop.f32.mrf.mxu1  ;;  %v1153_v35 = vpop.f32.mrf.mxu0 }
 0x1f2   : > { %v2364_v28 = vpop.f32.mrf.mxu2 }
 0x1f9   : > { %v1161_v29 = vpop.f32.mrf.mxu1 }
 0x1fa   : > { %v2366_v31 = vpop.f32.mrf.mxu2 }
 0x201   : > { %v1163_v32 = vpop.f32.mrf.mxu1 }
 0x208   : > { %v1238_v33 = vpop.f32.mrf.mxu3 }
 0x20e   : > { %v1180_v36 = vpop.f32.mrf.mxu1 }
 0x20f   : > { %v1181_v37 = vadd.f32 %v1180_v36, %v1151_v30 }
 0x210   : > { %v1209_v34 = vpop.f32.mrf.mxu2  ;;  %v1240_v38 = vpop.f32.mrf.mxu3 }
 0x211   : > { %v1210_v39 = vadd.f32 %v1209_v34, %v1181_v37 }
 0x213   : > { %v1239_v40 = vadd.f32 %v1238_v33, %v1210_v39 }
 0x216   : > { %v1267_v42 = vpop.f32.mrf.mxu0  ;;  %v1182_v43 = vpop.f32.mrf.mxu1 }
 0x217   : > { %v1268_v16 = vadd.f32 %v1267_v42, %v1239_v40  ;;  %v1183_v44 = vadd.f32 %v1182_v43, %v1153_v35 }
 0x218   : > { %v1211_v41 = vpop.f32.mrf.mxu2  ;;  %v1243_v45 = vpop.f32.mrf.mxu3 }
 0x219   : > { %1287 = vst.msk [vmem:[%s2374_s7] sm:$0xff] %vm1129_vm5, %v1268_v16  ;;  %v1212_v46 = vadd.f32 %v1211_v41, %v1183_v44 }
 0x21b   : > { %v1241_v47 = vadd.f32 %v1240_v38, %v1212_v46 }
 0x21e   : > { %v1269_v49 = vpop.f32.mrf.mxu0  ;;  %v1185_v50 = vpop.f32.mrf.mxu1 }
 0x21f   : > { %v1270_v51 = vadd.f32 %v1269_v49, %v1241_v47  ;;  %v1186_v52 = vadd.f32 %v1185_v50, %v1156_v22 }
 0x220   : > { %v1214_v48 = vpop.f32.mrf.mxu2  ;;  %v1245_v54 = vpop.f32.mrf.mxu3 }
 0x221   : > { %1288 = vst.msk [vmem:[%s2374_s7 + $0x8] sm:$0xff] %vm1129_vm5, %v1270_v51  ;;  %v1215_v53 = vadd.f32 %v1214_v48, %v1186_v52 }
 0x223   : > { %v1244_v55 = vadd.f32 %v1243_v45, %v1215_v53 }
 0x226   : > { %v1272_v57 = vpop.f32.mrf.mxu0  ;;  %v1187_v58 = vpop.f32.mrf.mxu1 }
 0x227   : > { %v1273_v59 = vadd.f32 %v1272_v57, %v1244_v55  ;;  %v1188_v60 = vadd.f32 %v1187_v58, %v1158_v26 }
 0x228   : > { %v1216_v56 = vpop.f32.mrf.mxu2  ;;  %v1248_v63 = vpop.f32.mrf.mxu3 }
 0x229   : > { %1289 = vst.msk [vmem:[%s2374_s7 + $0x10] sm:$0xff] %vm1129_vm5, %v1273_v59  ;;  %v1217_v61 = vadd.f32 %v1216_v56, %v1188_v60 }
 0x22b   : > { %v1246_v62 = vadd.f32 %v1245_v54, %v1217_v61 }
 0x22e   : > { %v1274_v1 = vpop.f32.mrf.mxu0  ;;  %v1190_v2 = vpop.f32.mrf.mxu1 }
 0x22f   : > { %v1275_v3 = vadd.f32 %v1274_v1, %v1246_v62  ;;  %v1191_v4 = vadd.f32 %v1190_v2, %v1161_v29 }
 0x230   : > { %v1219_v0 = vpop.f32.mrf.mxu2  ;;  %v1250_v8 = vpop.f32.mrf.mxu3 }
 0x231   : > { %1290 = vst.msk [vmem:[%s2374_s7 + $0x18] sm:$0xff] %vm1129_vm5, %v1275_v3  ;;  %v1220_v5 = vadd.f32 %v1219_v0, %v1191_v4 }
 0x233   : > { %v1249_v6 = vadd.f32 %v1248_v63, %v1220_v5 }
 0x236   : > { %v1277_v10 = vpop.f32.mrf.mxu0  ;;  %v1192_v11 = vpop.f32.mrf.mxu1 }
 0x237   : > { %v1278_v12 = vadd.f32 %v1277_v10, %v1249_v6  ;;  %v1193_v27 = vadd.f32 %v1192_v11, %v1163_v32 }
 0x238   : > { %v1221_v9 = vpop.f32.mrf.mxu2  ;;  %v1253_v20 = vpop.f32.mrf.mxu3 }
 0x239   : > { %1291 = vst.msk [vmem:[%s2374_s7 + $0x20] sm:$0xff] %vm1129_vm5, %v1278_v12  ;;  %v1222_v13 = vadd.f32 %v1221_v9, %v1193_v27 }
 0x23b   : > { %v1251_v14 = vadd.f32 %v1250_v8, %v1222_v13 }
 0x23e   : > { %v1279_v17 = vpop.f32.mrf.mxu0  ;;  %v1195_v18 = vpop.f32.mrf.mxu1 }
 0x23f   : > { %v1280_v7 = vadd.f32 %v1279_v17, %v1251_v14  ;;  %v1196_v19 = vadd.f32 %v1195_v18, %v2364_v28 }
 0x240   : > { %v1224_v15 = vpop.f32.mrf.mxu2  ;;  %v1255_v32 = vpop.f32.mrf.mxu3 }
 0x241   : > { %1292 = vst.msk [vmem:[%s2374_s7 + $0x28] sm:$0xff] %vm1129_vm5, %v1280_v7  ;;  %v1225_v23 = vadd.f32 %v1224_v15, %v1196_v19 }
 0x243   : > { %v1254_v24 = vadd.f32 %v1253_v20, %v1225_v23 }
 0x246   : > { %v1282_v25 = vpop.f32.mrf.mxu0  ;;  %v1197_v21 = vpop.f32.mrf.mxu1 }
 0x247   : > { %v1283_v22 = vadd.f32 %v1282_v25, %v1254_v24  ;;  %v1198_v26 = vadd.f32 %v1197_v21, %v2366_v31 }
 0x248   : > { %v1226_v29 = vpop.f32.mrf.mxu2 }
 0x249   : > { %1293 = vst.msk [vmem:[%s2374_s7 + $0x30] sm:$0xff] %vm1129_vm5, %v1283_v22  ;;  %v1227_v30 = vadd.f32 %v1226_v29, %v1198_v26 }
 0x24b   : > { %v1256_v33 = vadd.f32 %v1255_v32, %v1227_v30 }
 0x24e   : > { %v1284_v34 = vpop.f32.mrf.mxu0 }
 0x24f   : > { %v1285_v35 = vadd.f32 %v1284_v34, %v1256_v33 }
 0x251   : > { %1294 = vst.msk [vmem:[%s2374_s7 + $0x38] sm:$0xff] %vm1129_vm5, %v1285_v35 }
 0x252 PF: > { %s12_s15 = sadd.s32 1, %s1956_s15   ;;  %s2422_s9 = smov %s1936_s10 }
 0x253   : > { %p9_p12 = scmp.ge.s32.totalorder %s12_s15, 10   ;;  %s2423_s10 = smov %s2033_s22 }
 0x254   : > { %s2424_s11 = smov %s1948_s13  ;;  %s2425_s12 = smov %s1952_s14 }
 0x255   : > { %s2426_s13 = smov %s2429_s16  ;;  %s2427_s14 = smov %s2433_s17 }
 0x256   :  { %11 = sbr.rel (!%p9_p12) target bundleno = 4 (0x4), region = 104 }

</bundles_post_ra>
